<compile_context>
chip_gen: v7x
topology: tpu7x:2x2x1
jax: 0.10.0
libtpu: 0.0.40
codegen_flags: <defaults>
</compile_context>

<pallas_src>
import functools

import jax
import jax.numpy as jnp
from jax.experimental import pallas as pl
from jax.experimental.pallas import tpu as pltpu


def _batch_act_ce_kernel(x_ref, t_ref, o_ref, *, inv_hw, k_total, tk, mask_tail):
    kk = pl.program_id(2)

    @pl.when(kk == 0)
    def _():
        o_ref[...] = jnp.zeros_like(o_ref)

    x = x_ref[...].astype(jnp.float32)
    t = t_ref[...].astype(jnp.bfloat16)

    if mask_tail:
        # Ragged K tail: zero both operands past the true K so that
        #  (a) garbage/OOB t columns never contribute, and
        #  (b) pos stays finite there (pos(0)=log2, killed by t==0).
        rem = k_total - kk * tk
        x = jnp.where(jax.lax.broadcasted_iota(jnp.int32, x.shape, 1) < rem,
                      x, jnp.zeros_like(x))
        t = jnp.where(jax.lax.broadcasted_iota(jnp.int32, t.shape, 1) < rem,
                      t, jnp.zeros_like(t))

    # binary_cross_entropy_with_logits(x, target=1), reduction='none'
    #   = max(x, 0) - x + log(1 + exp(-|x|))
    pos = jnp.maximum(x, 0.0) - x + jnp.log1p(jnp.exp(-jnp.abs(x)))

    # einsum('nc,mc->nm') partial sum over this K tile: bf16 MXU operands,
    # f32 accumulation directly into the VMEM-resident output block.
    o_ref[...] += jax.lax.dot_general(
        pos.astype(jnp.bfloat16), t,
        dimension_numbers=(((1,), (1,)), ((), ())),
        preferred_element_type=jnp.float32,
    )

    @pl.when(kk == pl.num_programs(2) - 1)
    def _():
        o_ref[...] *= jnp.float32(inv_hw)


_VMEM_TARGET = 32 * 1024 * 1024   # working-set target (fits v7x's 64 MiB comfortably)
_VMEM_LIMIT = 48 * 1024 * 1024    # scoped VMEM limit we request (v5e default is 16 MiB)


def batch_act_ce_loss(prediction, label, *, tk_cap_override=None):
    """prediction, label: float arrays of identical arbitrary shape (N, d1, ...).

    Returns the (N, N) f32 loss matrix, matching the PyTorch module (including
    the intentionally-dropped negative-class term)."""
    assert prediction.shape == label.shape
    n = prediction.shape[0]
    hw = prediction.shape[1]

    # Flatten all dims after dim 0; keep the ORIGINAL dtype (no wrapper cast,
    # no wrapper pad -> no extra HBM pass).
    x = prediction.reshape(n, -1)   # (N, K)
    t = label.reshape(n, -1)        # (N, K)
    k = x.shape[1]
    isz = max(jnp.dtype(x.dtype).itemsize, jnp.dtype(t.dtype).itemsize)

    # --- tile selection ------------------------------------------------------
    if n <= 1024:
        # Resident-output path: (N, N) f32 output stays in VMEM for the whole
        # K sweep; every input element is read from HBM exactly once and the
        # EUP-heavy BCE transform runs exactly once per element.
        # For larger N keep a 2-way parallel row split so v7x's second
        # TensorCore has an axis to pick up (costs one extra read of t).
        row_blocks = 2 if (n >= 256 and n % 16 == 0) else 1
        tm = n // row_blocks
        tn = n
        grid_ij = (row_blocks, 1)
        out_bytes = 2 * n * n * 4
    else:
        # Large-N fallback: 512x512 output tiles (full MXU width on v6e/v7x),
        # K innermost so each output tile accumulates in VMEM.  N is never
        # padded: garbage edge rows/cols only affect nonexistent output cells.
        tm = tn = 512
        grid_ij = (pl.cdiv(n, tm), pl.cdiv(n, tn))
        out_bytes = 2 * tm * tn * 4

    # Double-buffered x and t tiles must fit the remaining budget.
    per_tk_bytes = 2 * (tm + tn) * isz
    tk_cap = (_VMEM_TARGET - out_bytes) // per_tk_bytes
    tk_cap = max(128, min(16384, (tk_cap // 128) * 128))
    if tk_cap_override is not None:
        tk_cap = max(128, (tk_cap_override // 128) * 128)

    if k <= tk_cap:
        tk = k                      # full-K block (always layout-legal), 1 step
    else:
        tk = tk_cap                 # multiple of 128
    mask_tail = (k % tk) != 0
    grid = grid_ij + (pl.cdiv(k, tk),)

    kernel = functools.partial(
        _batch_act_ce_kernel,
        inv_hw=1.0 / float(hw), k_total=k, tk=tk, mask_tail=mask_tail)

    return pl.pallas_call(
        kernel,
        out_shape=jax.ShapeDtypeStruct((n, n), jnp.float32),
        grid_spec=pltpu.PrefetchScalarGridSpec(
            num_scalar_prefetch=0,
            grid=grid,
            in_specs=[
                pl.BlockSpec((tm, tk), lambda i, j, kk: (i, kk)),
                pl.BlockSpec((tn, tk), lambda i, j, kk: (j, kk)),
            ],
            out_specs=pl.BlockSpec((tm, tn), lambda i, j, kk: (i, j)),
        ),
        compiler_params=pltpu.CompilerParams(
            dimension_semantics=("parallel", "parallel", "arbitrary"),
            vmem_limit_bytes=_VMEM_LIMIT),
    )(x, t)


def _reference(prediction, label):
    """Pure-JAX f32 reference with identical (bugged) semantics."""
    n = prediction.shape[0]
    hw = prediction.shape[1]
    x = prediction.reshape(n, -1).astype(jnp.float32)
    t = label.reshape(n, -1).astype(jnp.float32)
    pos = jnp.maximum(x, 0.0) - x + jnp.log1p(jnp.exp(-jnp.abs(x)))
    return jnp.einsum("nc,mc->nm", pos, t) / hw


if __name__ == "__main__":
    key = jax.random.PRNGKey(0)
    k1, k2, k3, k4 = jax.random.split(key, 4)

    # NCHW-style prediction / binary label: (B=2, C=4, H=16, W=16) -> hw=4, K=1024.
    prediction = jax.random.normal(k1, (2, 4, 16, 16), dtype=jnp.float32)
    label = (jax.random.uniform(k2, (2, 4, 16, 16)) > 0.5).astype(jnp.float32)

    ref = jax.block_until_ready(_reference(prediction, label))

    # 1) Default path: full-K block, resident (2,2) output, single grid step.
    #    (Tolerance reflects bf16 MXU operands with f32 accumulation.)
    out = jax.block_until_ready(batch_act_ce_loss(prediction, label))
    assert out.shape == (2, 2)
    assert jnp.allclose(out, ref, rtol=2e-2, atol=2e-2), (out, ref)

    # 2) Force K-tiled accumulation + ragged-tail masking
    #    (K=1024, tk=384 -> 3 k-steps, masked 256-wide tail).
    out_tiled = jax.block_until_ready(
        batch_act_ce_loss(prediction, label, tk_cap_override=384))
    assert jnp.allclose(out_tiled, ref, rtol=2e-2, atol=2e-2), (out_tiled, ref)

    # 3) K not a multiple of 128 (K=300, hw=3), tk=128 -> masked tail of 44 cols.
    prediction2 = jax.random.normal(k3, (2, 3, 10, 10), dtype=jnp.float32)
    label2 = (jax.random.uniform(k4, (2, 3, 10, 10)) > 0.5).astype(jnp.float32)
    ref2 = jax.block_until_ready(_reference(prediction2, label2))
    out2 = jax.block_until_ready(
        batch_act_ce_loss(prediction2, label2, tk_cap_override=128))
    assert jnp.allclose(out2, ref2, rtol=2e-2, atol=2e-2), (out2, ref2)

    print("KERNEL_OK")
</pallas_src>

<mosaic_0001>
module attributes {stable_mosaic.version = 11 : i64} {
  func.func @_batch_act_ce_kernel(%arg0: i32, %arg1: i32, %arg2: i32, %arg3: memref<2x1024xf32, #tpu.memory_space<vmem>>, %arg4: memref<2x1024xf32, #tpu.memory_space<vmem>>, %arg5: memref<2x2xf32, #tpu.memory_space<vmem>>) attributes {dimension_semantics = [#tpu.dimension_semantics<parallel>, #tpu.dimension_semantics<parallel>, #tpu.dimension_semantics<arbitrary>], iteration_bounds = array<i64: 1, 1, 1>, scalar_prefetch = 0 : i64, scratch_operands = 0 : i64, tpu.core_type = #tpu.core_type<tc>, window_params = [{transform_indices = @transform_0, window_bounds = array<i64: 2, 1024>}, {transform_indices = @transform_1, window_bounds = array<i64: 2, 1024>}, {transform_indices = @transform_2, window_bounds = array<i64: 2, 2>}]} {
    %c0_i32 = arith.constant 0 : i32
    %0 = arith.cmpi eq, %arg2, %c0_i32 : i32
    %1 = arith.extui %0 : i1 to i32
    %c0_i32_0 = arith.constant 0 : i32
    %2 = arith.cmpi ne, %1, %c0_i32_0 : i32
    scf.if %2 {
      %cst_12 = arith.constant 0.000000e+00 : f32
      %23 = vector.broadcast %cst_12 : f32 to vector<2x2xf32>
      %c0_13 = arith.constant 0 : index
      %c0_14 = arith.constant 0 : index
      %24 = vector.load %arg5[%c0_13, %c0_14] : memref<2x2xf32, #tpu.memory_space<vmem>>, vector<2x2xf32>
      tpu.vector_store %arg5[%c0_13, %c0_14], %23 {strides = array<i32>} : memref<2x2xf32, #tpu.memory_space<vmem>>, vector<2x2xf32>,
    } else {
    }
    %c0 = arith.constant 0 : index
    %c0_1 = arith.constant 0 : index
    %3 = vector.load %arg3[%c0, %c0_1] : memref<2x1024xf32, #tpu.memory_space<vmem>>, vector<2x1024xf32>
    %c0_2 = arith.constant 0 : index
    %c0_3 = arith.constant 0 : index
    %4 = vector.load %arg4[%c0_2, %c0_3] : memref<2x1024xf32, #tpu.memory_space<vmem>>, vector<2x1024xf32>
    %5 = arith.truncf %4 : vector<2x1024xf32> to vector<2x1024xbf16>
    %cst = arith.constant 0.000000e+00 : f32
    %6 = vector.broadcast %cst : f32 to vector<2x1024xf32>
    %7 = arith.maximumf %3, %6 : vector<2x1024xf32>
    %8 = arith.subf %7, %3 : vector<2x1024xf32>
    %9 = math.absf %3 : vector<2x1024xf32>
    %cst_4 = arith.constant 0.000000e+00 : f32
    %10 = vector.broadcast %cst_4 : f32 to vector<2x1024xf32>
    %11 = arith.subf %10, %9 : vector<2x1024xf32>
    %12 = math.exp %11 : vector<2x1024xf32>
    %13 = math.log1p %12 : vector<2x1024xf32>
    %14 = arith.addf %8, %13 : vector<2x1024xf32>
    %c0_5 = arith.constant 0 : index
    %c0_6 = arith.constant 0 : index
    %15 = vector.load %arg5[%c0_5, %c0_6] : memref<2x2xf32, #tpu.memory_space<vmem>>, vector<2x2xf32>
    %16 = arith.truncf %14 : vector<2x1024xf32> to vector<2x1024xbf16>
    %cst_7 = arith.constant dense<0.000000e+00> : vector<2x2xf32>
    %17 = tpu.matmul %16, %5, %cst_7 {dimension_numbers = #tpu.dot_dimension_numbers<[1], [1], [0], [0], [0, 0, 1, 0], [], []>} : vector<2x1024xbf16>, vector<2x1024xbf16>, vector<2x2xf32> -> vector<2x2xf32>
    %18 = arith.addf %15, %17 : vector<2x2xf32>
    %c0_8 = arith.constant 0 : index
    %c0_9 = arith.constant 0 : index
    %19 = vector.load %arg5[%c0_8, %c0_9] : memref<2x2xf32, #tpu.memory_space<vmem>>, vector<2x2xf32>
    tpu.vector_store %arg5[%c0_8, %c0_9], %18 {strides = array<i32>} : memref<2x2xf32, #tpu.memory_space<vmem>>, vector<2x2xf32>,
    %c0_i32_10 = arith.constant 0 : i32
    %20 = arith.cmpi eq, %arg2, %c0_i32_10 : i32
    %21 = arith.extui %20 : i1 to i32
    %c0_i32_11 = arith.constant 0 : i32
    %22 = arith.cmpi ne, %21, %c0_i32_11 : i32
    scf.if %22 {
      %c0_12 = arith.constant 0 : index
      %c0_13 = arith.constant 0 : index
      %23 = vector.load %arg5[%c0_12, %c0_13] : memref<2x2xf32, #tpu.memory_space<vmem>>, vector<2x2xf32>
      %cst_14 = arith.constant 2.500000e-01 : f32
      %24 = vector.broadcast %cst_14 : f32 to vector<2x2xf32>
      %25 = arith.mulf %23, %24 : vector<2x2xf32>
      %c0_15 = arith.constant 0 : index
      %c0_16 = arith.constant 0 : index
      %26 = vector.load %arg5[%c0_15, %c0_16] : memref<2x2xf32, #tpu.memory_space<vmem>>, vector<2x2xf32>
      tpu.vector_store %arg5[%c0_15, %c0_16], %25 {strides = array<i32>} : memref<2x2xf32, #tpu.memory_space<vmem>>, vector<2x2xf32>,
    } else {
    }
    return
  }
  func.func @transform_0(%arg0: i32, %arg1: i32, %arg2: i32) -> (i32, i32) {
    %c0_i32 = arith.constant 0 : i32
    return %arg0, %arg2 : i32, i32
  }
  func.func @transform_1(%arg0: i32, %arg1: i32, %arg2: i32) -> (i32, i32) {
    %c0_i32 = arith.constant 0 : i32
    return %arg1, %arg2 : i32, i32
  }
  func.func @transform_2(%arg0: i32, %arg1: i32, %arg2: i32) -> (i32, i32) {
    %c0_i32 = arith.constant 0 : i32
    return %arg0, %arg1 : i32, i32
  }
}

</mosaic_0001>

<bundles_post_ra>
// kernel: tpu_custom_call.1
= control target key start
LH: loop header
LB: loop body
LE: loop exit
PB: predicated region body
PF: predicated region fallthrough
CT: control target
= control target key end

     0   :  { %7 = vsyncpa [#allocation3], 0  ;;  %s537_s0 = inlined_call_operand.hbm [shape: f32[2,1024], index: 0, kind: input, shape index: {}]   ;;  %s538_s1 = inlined_call_operand.hbm [shape: f32[2,1024], index: 1, kind: input, shape index: {}]   ;;  %s539_s2 = inlined_call_operand.hbm [shape: f32[2,2], index: 2, kind: output, shape index: {}]  }
   0x1   :  { %8 = vsyncpa [#allocation6], 0 }
   0x2   :  { %9 = vsyncpa [#allocation4], 0  ;;  %s456_s9 = smov [#allocation2]   ;;  %s457_s11 = smov [#allocation5]  }
   0x3   :  { %s16_s10 = sshll.u32 %s456_s9, 4  ;;  %s26_s12 = sshll.u32 %s457_s11, 4  ;;  %s17_s10 = int_to_ptr.vmem [resolvable:$true] %s16_s10  ;;  %s27_s12 = int_to_ptr.vmem [resolvable:$true] %s26_s12 }
   0x4   :  { %s384_s15 = scalar_lea.hbm %s537_s0, 256 }
   0x5   :  { %p385_p0 = scmp.ne.s32.totalorder %s537_s0, %s384_s15  ;;  %p388_p1 = scmp.lt.u32.totalorder %s384_s15, %s537_s0 }
   0x7   :  { %p390_p2 = pnand %p388_p1, %p385_p0 }
   0x9   :  { %393 = shalt.err (!%p390_p2)
}
   0xa   :  { %s394_s20 = scalar_lea.vmem %s17_s10, 256  ;;  %p399_p4 = scmp.lt.s32.totalorder %s17_s10, %s17_s10 }
   0xb   :  { %p395_p3 = scmp.ne.s32.totalorder %s17_s10, %s394_s20  ;;  %p400_p5 = scmp.lt.s32.totalorder %s394_s20, %s394_s20 }
   0xd   :  { %p401_p6 = por %p400_p5, %p399_p4 }
   0xf   :  { %p402_p7 = pnand %p401_p6, %p395_p3 }
  0x11   :  { %405 = shalt.err (!%p402_p7)
}
  0x12   :  { %19 = dma.hbm_to_vmem [thread:$0]  %s537_s0, 256, %s17_s10, [#allocation3]  }
  0x13   :  { %s406_s25 = scalar_lea.hbm %s538_s1, 256 }
  0x14   :  { %p407_p8 = scmp.ne.s32.totalorder %s538_s1, %s406_s25  ;;  %p410_p9 = scmp.lt.u32.totalorder %s406_s25, %s538_s1 }
  0x16   :  { %p412_p10 = pnand %p410_p9, %p407_p8 }
  0x18   :  { %415 = shalt.err (!%p412_p10)
}
  0x19   :  { %s416_s30 = scalar_lea.vmem %s27_s12, 256  ;;  %p421_p12 = scmp.lt.s32.totalorder %s27_s12, %s27_s12 }
  0x1a   :  { %p417_p11 = scmp.ne.s32.totalorder %s27_s12, %s416_s30  ;;  %p422_p13 = scmp.lt.s32.totalorder %s416_s30, %s416_s30 }
  0x1c   :  { %p423_p0 = por %p422_p13, %p421_p12 }
  0x1e   :  { %p424_p1 = pnand %p423_p0, %p417_p11 }
  0x20   :  { %427 = shalt.err (!%p424_p1)
}
  0x21   :  { %29 = dma.hbm_to_vmem [thread:$0]  %s538_s1, 256, %s27_s12, [#allocation6]  }
  0x22   :  { %450 = dma.done.wait [#allocation3], 256  }
  0x23   :  { %451 = vsyncadd [#allocation3], 4294967040 }
  0x24   :  { %452 = dma.done.wait [#allocation6], 256  }
  0x25   :  { %453 = vsyncadd [#allocation6], 4294967040  ;;  %v53_v0 = vlaneseq  ;;  %v458_v1 = vmov 1983009808   ;;  %v45_v6 = vld [vmem:[#allocation5] sm:$0xff]  ;;  %v43_v7 = vld [vmem:[#allocation2] sm:$0xff] }
  0x26   :  { %v51_v2 = vunpack.c.l.s4 %v458_v1  ;;  %v46_v8 = vld [vmem:[#allocation5 + $0x8] sm:$0xff]  ;;  %v49_v10 = vcombine.high %v45_v6, %v45_v6  ;;  %v103_v11 = vand.u32 2147483647, %v43_v7  ;;  %v44_v12 = vld [vmem:[#allocation2 + $0x8] sm:$0xff]  ;;  %v99_v39 = vmax.f32 %v43_v7, 0.0  ;;  %s460_s1 = smov [#allocation7]  }
  0x27   :  { %v54_v3 = vshrl.u32 %v53_v0, 7  ;;  %v66_v14 = vcombine.high %v46_v8, %v46_v8  ;;  %v104_v17 = vand.u32 2147483647, %v44_v12  ;;  %v100_v43 = vmax.f32 %v44_v12, 0.0  ;;  %s359_s4 = sshll.u32 %s460_s1, 4  ;;  %s360_s4 = int_to_ptr.vmem [resolvable:$true] %s359_s4 }
  0x28   :  { %v52_v4 = vunpack.c.0.s8 %v51_v2  ;;  %v105_v19 = vsub.f32 0.0, %v103_v11  ;;  %v101_v46 = vsub.f32 %v99_v39, %v43_v7  ;;  %vm41_vm2 = vcmask 9216   ;;  %s428_s5 = scalar_lea.vmem %s360_s4, 32  ;;  %p433_p3 = scmp.lt.s32.totalorder %s360_s4, %s360_s4 }
  0x29   :  { %v106_v29 = vsub.f32 0.0, %v104_v17  ;;  %v102_v51 = vsub.f32 %v100_v43, %v44_v12  ;;  %p429_p2 = scmp.ne.s32.totalorder %s360_s4, %s428_s5  ;;  %p434_p4 = scmp.lt.s32.totalorder %s428_s5, %s428_s5 }
  0x2a   :  { %v500_v5 = vsub.s32 %v52_v4, %v54_v3  ;;  %v107_v25 = vmul.f32 1.442695, %v105_v19 }
  0x2b   :  { %v109_v31 = vmul.f32 1.442695, %v106_v29  ;;  %p435_p5 = por %p434_p4, %p433_p3 }
  0x2c   :  { %v56_v9 = vrot.slane %v45_v6, %v500_v5  ;;  %v504_v13 = vrot.slane %v46_v8, %v500_v5  ;;  %v63_v16 = vrot.slane %v49_v10, %v500_v5  ;;  %v510_v21 = vrot.slane %v66_v14, %v500_v5 }
  0x2d   :  { %376 = vpow2.f32 %v107_v25  ;;  %p436_p6 = pnand %p435_p5, %p429_p2 }
  0x2e   :  { %v64_v15 = vcombine.high %v56_v9, %v56_v9  ;;  %v91_v18 = vpack.c.bf16 %v56_v9, %v56_v9  ;;  %v81_v20 = vcombine.high %v504_v13, %v504_v13  ;;  %v65_v23 = vcombine.high %v63_v16, %v63_v16 }
  0x2f   :  { %v93_v24 = vpack.c.bf16 %v63_v16, %v63_v16  ;;  %v82_v27 = vcombine.high %v510_v21, %v510_v21  ;;  %378 = vpow2.f32 %v109_v31  ;;  %v95_v0 = vpack.c.bf16 %v504_v13, %v504_v13 }
  0x30   :  { %v92_v22 = vpack.c.bf16 %v64_v15, %v64_v15  ;;  %v96_v26 = vpack.c.bf16 %v81_v20, %v81_v20  ;;  %v94_v28 = vpack.c.bf16 %v65_v23, %v65_v23  ;;  %v97_v7 = vpack.c.bf16 %v510_v21, %v510_v21 }
  0x31   :  { %v98_v30 = vpack.c.bf16 %v82_v27, %v82_v27 }
  0x32   :  { %184 = vmatprep.subr.bf16.mxu0 %v92_v22  ;;  %224 = vmatprep.subr.bf16.mxu1 %v94_v28 }
  0x33   :  { %185 = vmatpush1.bf16.xpose.msra.mxu0 %v91_v18  ;;  %225 = vmatpush1.bf16.xpose.msra.mxu1 %v93_v24 }
  0x34   :  { %264 = vmatprep.subr.bf16.mxu0 %v96_v26  ;;  %304 = vmatprep.subr.bf16.mxu1 %v98_v30 }
  0x37   :  { %v377_v32 = vpop.eup %376 }
  0x38   :  { %v111_v33 = vadd.f32 1.0, %v377_v32  ;;  %v114_v35 = vmul.f32 -0.5, %v377_v32  ;;  %v117_v40 = vand.u32 2147483647, %v377_v32 }
  0x39   :  { %v379_v34 = vpop.eup %378 }
  0x3a   :  { %380 = vlog2.f32 %v111_v33  ;;  %v120_v36 = vadd.f32 1.0, %v379_v34  ;;  %v123_v37 = vmul.f32 -0.5, %v379_v34  ;;  %v115_v38 = vadd.f32 1.0, %v114_v35 }
  0x3b   :  { %v126_v44 = vand.u32 2147483647, %v379_v34  ;;  %vm118_vm0 = vcmp.lt.f32.partialorder %v117_v40, 0.0004427343 }
  0x3c   :  { %382 = vlog2.f32 %v120_v36  ;;  %v124_v41 = vadd.f32 1.0, %v123_v37  ;;  %v116_v42 = vmul.f32 %v377_v32, %v115_v38 }
  0x3d   :  { %vm127_vm1 = vcmp.lt.f32.partialorder %v126_v44, 0.0004427343 }
  0x3e   :  { %v125_v48 = vmul.f32 %v379_v34, %v124_v41 }
  0x44   :  { %v381_v45 = vpop.eup %380 }
  0x45   :  { %v113_v47 = vmul.f32 0.6931472, %v381_v45 }
  0x46   :  { %v383_v49 = vpop.eup %382 }
  0x47   :  { %v119_v50 = vsel %vm118_vm0, %v116_v42, %v113_v47  ;;  %v122_v53 = vmul.f32 0.6931472, %v383_v49 }
  0x48   :  { %v129_v52 = vadd.f32 %v119_v50, %v101_v46 }
  0x49   :  { %v128_v56 = vsel %vm127_vm1, %v125_v48, %v122_v53 }
  0x4a   :  { %v141_v54 = vrot.slane %v129_v52, %v500_v5  ;;  %v134_v55 = vcombine.high %v129_v52, %v129_v52  ;;  %v130_v57 = vadd.f32 %v128_v56, %v102_v51 }
  0x4c   :  { %v149_v58 = vcombine.high %v141_v54, %v141_v54  ;;  %v148_v59 = vrot.slane %v134_v55, %v500_v5  ;;  %v176_v60 = vpack.c.bf16 %v141_v54, %v141_v54  ;;  %v158_v61 = vrot.slane %v130_v57, %v500_v5 }
  0x4d   :  { %v151_v62 = vcombine.high %v130_v57, %v130_v57 }
  0x4e   :  { %v177_v63 = vpack.c.bf16 %v149_v58, %v149_v58  ;;  %v150_v1 = vcombine.high %v148_v59, %v148_v59  ;;  %v178_v2 = vpack.c.bf16 %v148_v59, %v148_v59  ;;  %v166_v3 = vcombine.high %v158_v61, %v158_v61 }
  0x4f   :  { %v165_v4 = vrot.slane %v151_v62, %v500_v5  ;;  %v180_v11 = vpack.c.bf16 %v158_v61, %v158_v61  ;;  %v459_v5 = vmov 0.0  }
  0x50   :  { %216 = vmatprep.mubr.bf16.mxu0 %v177_v63  ;;  %v179_v6 = vpack.c.bf16 %v150_v1, %v150_v1  ;;  %v181_v8 = vpack.c.bf16 %v166_v3, %v166_v3  ;;  %42 = vst.msk [vmem:[#allocation7] sm:$0x3] %vm41_vm2, %v459_v5 }
  0x51   :  { %217 = vmatmul.mubr.bf16.vlgmr.msra.gmra.mrb[0].mxu0 %v176_v60  ;;  %v167_v9 = vcombine.high %v165_v4, %v165_v4  ;;  %v182_v12 = vpack.c.bf16 %v165_v4, %v165_v4 }
  0x52   :  { %265 = vmatpush1.bf16.xpose.msra.mxu0 %v95_v0  ;;  %256 = vmatprep.mubr.bf16.mxu1 %v179_v6 }
  0x53   :  { %257 = vmatmul.mubr.bf16.vlgmr.msra.gmra.mrb[0].mxu1 %v178_v2  ;;  %296 = vmatprep.mubr.bf16.mxu0 %v181_v8  ;;  %v183_v10 = vpack.c.bf16 %v167_v9, %v167_v9 }
  0x54   :  { %305 = vmatpush1.bf16.xpose.msra.mxu1 %v97_v7 }
  0x55   :  { %336 = vmatprep.mubr.bf16.mxu1 %v183_v10 }
  0x57   :  { %v131_v26 = vld [vmem:[#allocation7] sm:$0x3] }
  0x59   :  { %297 = vmatmul.mubr.bf16.vlgmr.msra.gmra.mrb[4].mxu0 %v180_v11 }
  0x5b   :  { %337 = vmatmul.mubr.bf16.vlgmr.msra.gmra.mrb[4].mxu1 %v182_v12 }
 0x124   :  { %v218_v13 = vpop.f32.mrb[0].mxu0 }
 0x125   :  { %v220_v14 = vpop.f32.mrb[1].mxu0 }
 0x126   :  { %v221_v15 = vpop.f32.mrb[2].mxu0  ;;  %v258_v16 = vpop.f32.mrb[0].mxu1 }
 0x127   :  { %v259_v17 = vadd.f32 %v258_v16, %v218_v13  ;;  %v222_v18 = vpop.f32.mrb[3].mxu0  ;;  %v260_v19 = vpop.f32.mrb[1].mxu1 }
 0x128   :  { %v261_v20 = vpop.f32.mrb[2].mxu1 }
 0x129   :  { %v262_v21 = vpop.f32.mrb[3].mxu1 }
 0x12c   :  { %v298_v22 = vpop.f32.mrb[4].mxu0 }
 0x12d   :  { %v299_v23 = vadd.f32 %v298_v22, %v259_v17  ;;  %v300_v24 = vpop.f32.mrb[5].mxu0 }
 0x12e   :  { %v301_v25 = vpop.f32.mrb[6].mxu0  ;;  %v338_v27 = vpop.f32.mrb[4].mxu1 }
 0x12f   :  { %v339_v28 = vadd.f32 %v338_v27, %v299_v23  ;;  %v302_v29 = vpop.f32.mrb[7].mxu0  ;;  %v340_v30 = vpop.f32.mrb[5].mxu1 }
 0x130   :  { %v341_v31 = vpop.f32.mrb[6].mxu1 }
 0x131   :  { %v344_v32 = vadd.f32 %v339_v28, %v131_v26  ;;  %v342_v33 = vpop.f32.mrb[7].mxu1 }
 0x133   :  { %346 = vst.msk [vmem:[#allocation7] sm:$0x3] %vm41_vm2, %v344_v32 }
 0x13a   :  { %v350_v34 = vld [vmem:[#allocation7] sm:$0x3] }
 0x13b   :  { %v351_v35 = vmul.f32 0.25, %v350_v34 }
 0x13d   :  { %352 = vst.msk [vmem:[#allocation7] sm:$0x3] %vm41_vm2, %v351_v35 }
 0x13e   :  { %439 = shalt.err (!%p436_p6)
}
 0x13f   :  { %s440_s8 = scalar_lea.hbm %s539_s2, 32 }
 0x140   :  { %p441_p7 = scmp.ne.s32.totalorder %s539_s2, %s440_s8  ;;  %p444_p8 = scmp.lt.u32.totalorder %s440_s8, %s539_s2 }
 0x142   :  { %p446_p9 = pnand %p444_p8, %p441_p7 }
 0x144   :  { %449 = shalt.err (!%p446_p9)
}
 0x145   :  { %362 = dma.vmem_to_hbm [thread:$0]  %s360_s4, 32, %s539_s2, [#allocation4]  }
 0x146   :  { %454 = dma.done.wait [#allocation4], 32  }
 0x147   :  { %455 = vsyncadd [#allocation4], 4294967264 }
 0x148   :  { %366 = vsyncpa [#allocation3], 1 }
 0x149   :  { %367 = vsyncpa [#allocation6], 1 }
 0x14a   :  { %368 = vsyncpa [#allocation4], 1 }

</bundles_post_ra>
